<compile_context>
chip_gen: v6e
topology: v6e:2x2x1
jax: 0.10.0
libtpu: 0.0.40
codegen_flags: <defaults>
</compile_context>

<pallas_src>
import jax
import jax.numpy as jnp
from jax.experimental import pallas as pl
from jax.experimental.pallas import tpu as pltpu

_OUT_LANES = 128  # merged lane-dense output width (cols 0:2 log_probs, 2:22 conv out)


def _cnn_model_kernel(x_ref, wc_ref, bc_ref, wf_ref, bf_ref, out_ref):
    x = x_ref[...]                        # (Bt, 784)  f32
    wc = wc_ref[...]                      # (784, 20)  conv weight, pre-transposed
    bc = bc_ref[...]                      # (1, 20)

    # --- conv1 (full-image kernel == matmul on the MXU, K=784) ---
    c = jnp.dot(x, wc, preferred_element_type=jnp.float32) + bc      # (Bt, 20)

    # --- fc1 (20 -> 2): single MXU matmul (weight pre-transposed to (20, 2)) ---
    wf = wf_ref[...]                      # (20, 2)
    bf = bf_ref[...]                      # (1, 2)
    y = jnp.dot(c, wf, preferred_element_type=jnp.float32) + bf      # (Bt, 2)

    # --- LeakyReLU (negative_slope = 0.01, PyTorch default) ---
    y = jnp.where(y > 0, y, 0.01 * y)

    # --- log_softmax over dim 1 (max-subtracted, stable) ---
    m = jnp.max(y, axis=1, keepdims=True)
    z = y - m
    lse = jnp.log(jnp.sum(jnp.exp(z), axis=1, keepdims=True))
    logp = z - lse                                                    # (Bt, 2)

    # --- single lane-dense store: [log_probs | conv_out | zeros] -> (Bt, 128) ---
    n_pad = out_ref.shape[1] - (logp.shape[1] + c.shape[1])
    pad = jnp.zeros((x.shape[0], n_pad), dtype=jnp.float32)
    out_ref[...] = jnp.concatenate([logp, c, pad], axis=-1)


def _round_up(n, m):
    return ((n + m - 1) // m) * m


def _pick_batch_tile(B):
    if B <= 512:
        return B
    # Target ~2048-row tiles; force an even tile count >= 2 so v7x's two TensorCores
    # split the (parallel) batch grid evenly.  Always a multiple of 8.
    n_tiles = max(2, -(-B // 2048))
    if n_tiles % 2:
        n_tiles += 1
    return _round_up(-(-B // n_tiles), 8)


def cnn_model_forward(x, conv_w, conv_b, fc1_w, fc1_b):
    """x: (B, 1, 28, 28) NCHW f32.  Returns (log_probs, c_output, None, None)
    matching CNNModel.forward (epoch/experiment args are host-side only)."""
    B = x.shape[0]
    C_conv, C_in, KH, KW = conv_w.shape           # (20, 1, 28, 28)
    assert x.shape[1:] == (C_in, KH, KW)
    HW = C_in * KH * KW                           # 784
    C_fc = fc1_w.shape[0]                         # 2
    assert C_fc + C_conv <= _OUT_LANES

    # glue: flatten / transpose weights (pure layout, no compute)
    x_flat = x.reshape(B, HW).astype(jnp.float32)                     # (B, 784)
    wc = conv_w.reshape(C_conv, HW).T.astype(jnp.float32)             # (784, 20)
    bc = conv_b.reshape(1, C_conv).astype(jnp.float32)                # (1, 20)
    wf = fc1_w.T.astype(jnp.float32)                                  # (20, 2)
    bf = fc1_b.reshape(1, C_fc).astype(jnp.float32)                   # (1, 2)

    B_TILE = _pick_batch_tile(B)
    grid = (pl.cdiv(B, B_TILE),)

    in_specs = [
        pl.BlockSpec((B_TILE, HW), lambda i: (i, 0)),       # x tile, pipelined over batch
        pl.BlockSpec((HW, C_conv), lambda i: (0, 0)),       # conv weight (resident)
        pl.BlockSpec((1, C_conv), lambda i: (0, 0)),        # conv bias
        pl.BlockSpec((C_conv, C_fc), lambda i: (0, 0)),     # fc1 weight (pre-transposed)
        pl.BlockSpec((1, C_fc), lambda i: (0, 0)),          # fc1 bias
    ]
    out_specs = pl.BlockSpec((B_TILE, _OUT_LANES), lambda i: (i, 0))
    out_shape = jax.ShapeDtypeStruct((B, _OUT_LANES), jnp.float32)

    param_bytes = (HW * C_conv + C_conv + C_conv * C_fc + C_fc) * 4
    cost = pl.CostEstimate(
        flops=2 * B * HW * C_conv + 2 * B * C_conv * C_fc,
        transcendentals=B * C_fc,
        bytes_accessed=B * HW * 4 + B * _OUT_LANES * 4 + param_bytes,
    )

    merged = pl.pallas_call(
        _cnn_model_kernel,
        grid=grid,
        in_specs=in_specs,
        out_specs=out_specs,
        out_shape=out_shape,
        compiler_params=pltpu.CompilerParams(
            dimension_semantics=("parallel",),   # batch tiles independent (v7x 2-TC split)
            vmem_limit_bytes=32 << 20,           # keeps 2048-row tiles legal on v5e too
        ),
        cost_estimate=cost,
    )(x_flat, wc, bc, wf, bf)

    log_probs = merged[:, :C_fc]                               # (B, 2)
    c_output = merged[:, C_fc:C_fc + C_conv].reshape(B, C_conv, 1, 1)
    return log_probs, c_output, None, None


if __name__ == "__main__":
    key = jax.random.PRNGKey(0)
    k_x, k_wc, k_bc, k_wf, k_bf = jax.random.split(key, 5)

    B, C_in, H, W = 2, 1, 28, 28      # Conv2d(1, 20, kernel_size=28) -> MNIST-like input
    C_conv = 20                       # conv output channels
    C_fc = 2                          # fc1 = nn.Linear(20, 2)

    # deterministic synthetic parameters (PyTorch-default-like init ranges)
    x = jax.random.normal(k_x, (B, C_in, H, W), dtype=jnp.float32)
    bound_c = 1.0 / float(C_in * H * W) ** 0.5
    conv_w = jax.random.uniform(k_wc, (C_conv, C_in, H, W), jnp.float32, -bound_c, bound_c)
    conv_b = jax.random.uniform(k_bc, (C_conv,), jnp.float32, -bound_c, bound_c)
    bound_f = 1.0 / float(C_conv) ** 0.5
    fc1_w = jax.random.uniform(k_wf, (C_fc, C_conv), jnp.float32, -bound_f, bound_f)
    fc1_b = jax.random.uniform(k_bf, (C_fc,), jnp.float32, -bound_f, bound_f)

    log_probs, c_output, _, _ = cnn_model_forward(x, conv_w, conv_b, fc1_w, fc1_b)
    jax.block_until_ready((log_probs, c_output))

    assert log_probs.shape == (B, C_fc)
    assert c_output.shape == (B, C_conv, 1, 1)
    # log_softmax sanity: rows of exp(log_probs) sum to 1
    assert jnp.allclose(jnp.sum(jnp.exp(log_probs), axis=1), 1.0, atol=1e-5)

    # pure-JAX reference check of the whole forward pass
    c_ref = jnp.einsum("bp,fp->bf", x.reshape(B, -1), conv_w.reshape(C_conv, -1)) + conv_b
    y_ref = c_ref @ fc1_w.T + fc1_b
    y_ref = jnp.where(y_ref > 0, y_ref, 0.01 * y_ref)
    lp_ref = y_ref - jax.scipy.special.logsumexp(y_ref, axis=1, keepdims=True)
    assert jnp.allclose(c_output.reshape(B, C_conv), c_ref, atol=1e-4)
    assert jnp.allclose(log_probs, lp_ref, atol=1e-4)

    print("KERNEL_OK")
</pallas_src>

<mosaic_0001>
module attributes {stable_mosaic.version = 11 : i64} {
  func.func @_cnn_model_kernel(%arg0: i32, %arg1: memref<2x784xf32, #tpu.memory_space<vmem>>, %arg2: memref<784x20xf32, #tpu.memory_space<vmem>>, %arg3: memref<1x20xf32, #tpu.memory_space<vmem>>, %arg4: memref<20x2xf32, #tpu.memory_space<vmem>>, %arg5: memref<1x2xf32, #tpu.memory_space<vmem>>, %arg6: memref<2x128xf32, #tpu.memory_space<vmem>>) attributes {dimension_semantics = [#tpu.dimension_semantics<parallel>], iteration_bounds = array<i64: 1>, scalar_prefetch = 0 : i64, scratch_operands = 0 : i64, tpu.core_type = #tpu.core_type<tc>, window_params = [{transform_indices = @transform_0, window_bounds = array<i64: 2, 784>}, {pipeline_mode = #tpu.pipeline_mode<synchronous>, transform_indices = @transform_1, window_bounds = array<i64: 784, 20>}, {pipeline_mode = #tpu.pipeline_mode<synchronous>, transform_indices = @transform_2, window_bounds = array<i64: 1, 20>}, {pipeline_mode = #tpu.pipeline_mode<synchronous>, transform_indices = @transform_3, window_bounds = array<i64: 20, 2>}, {pipeline_mode = #tpu.pipeline_mode<synchronous>, transform_indices = @transform_4, window_bounds = array<i64: 1, 2>}, {transform_indices = @transform_5, window_bounds = array<i64: 2, 128>}]} {
    %c0 = arith.constant 0 : index
    %c0_0 = arith.constant 0 : index
    %0 = vector.load %arg1[%c0, %c0_0] : memref<2x784xf32, #tpu.memory_space<vmem>>, vector<2x784xf32>
    %c0_1 = arith.constant 0 : index
    %c0_2 = arith.constant 0 : index
    %1 = vector.load %arg2[%c0_1, %c0_2] : memref<784x20xf32, #tpu.memory_space<vmem>>, vector<784x20xf32>
    %c0_3 = arith.constant 0 : index
    %c0_4 = arith.constant 0 : index
    %2 = vector.load %arg3[%c0_3, %c0_4] : memref<1x20xf32, #tpu.memory_space<vmem>>, vector<1x20xf32>
    %cst = arith.constant dense<0.000000e+00> : vector<2x20xf32>
    %3 = tpu.matmul %0, %1, %cst {dimension_numbers = #tpu.dot_dimension_numbers<[1], [0], [0], [1], [0, 0, 1, 1], [], []>} : vector<2x784xf32>, vector<784x20xf32>, vector<2x20xf32> -> vector<2x20xf32>
    %4 = vector.broadcast %2 : vector<1x20xf32> to vector<2x20xf32>
    %5 = arith.addf %3, %4 : vector<2x20xf32>
    %c0_5 = arith.constant 0 : index
    %c0_6 = arith.constant 0 : index
    %6 = vector.load %arg4[%c0_5, %c0_6] : memref<20x2xf32, #tpu.memory_space<vmem>>, vector<20x2xf32>
    %c0_7 = arith.constant 0 : index
    %c0_8 = arith.constant 0 : index
    %7 = vector.load %arg5[%c0_7, %c0_8] : memref<1x2xf32, #tpu.memory_space<vmem>>, vector<1x2xf32>
    %cst_9 = arith.constant dense<0.000000e+00> : vector<2x2xf32>
    %8 = tpu.matmul %5, %6, %cst_9 {dimension_numbers = #tpu.dot_dimension_numbers<[1], [0], [0], [1], [0, 0, 1, 1], [], []>} : vector<2x20xf32>, vector<20x2xf32>, vector<2x2xf32> -> vector<2x2xf32>
    %9 = vector.broadcast %7 : vector<1x2xf32> to vector<2x2xf32>
    %10 = arith.addf %8, %9 : vector<2x2xf32>
    %cst_10 = arith.constant 0.000000e+00 : f32
    %11 = vector.broadcast %cst_10 : f32 to vector<2x2xf32>
    %12 = arith.cmpf ogt, %10, %11 : vector<2x2xf32>
    %cst_11 = arith.constant 0.00999999977 : f32
    %13 = vector.broadcast %cst_11 : f32 to vector<2x2xf32>
    %14 = arith.mulf %13, %10 : vector<2x2xf32>
    %15 = arith.select %12, %10, %14 : vector<2x2xi1>, vector<2x2xf32>
    %cst_12 = arith.constant dense<0xFF800000> : vector<2xf32>
    %16 = vector.multi_reduction <maximumf>, %15, %cst_12 [1] : vector<2x2xf32> to vector<2xf32>
    %17 = vector.shape_cast %16 : vector<2xf32> to vector<2x1xf32>
    %18 = vector.broadcast %17 : vector<2x1xf32> to vector<2x2xf32>
    %19 = arith.subf %15, %18 : vector<2x2xf32>
    %20 = math.exp %19 : vector<2x2xf32>
    %cst_13 = arith.constant dense<0.000000e+00> : vector<2xf32>
    %21 = vector.multi_reduction <add>, %20, %cst_13 [1] : vector<2x2xf32> to vector<2xf32>
    %22 = vector.shape_cast %21 : vector<2xf32> to vector<2x1xf32>
    %23 = math.log %22 : vector<2x1xf32>
    %24 = vector.broadcast %23 : vector<2x1xf32> to vector<2x2xf32>
    %25 = arith.subf %19, %24 : vector<2x2xf32>
    %cst_14 = arith.constant 0.000000e+00 : f32
    %26 = vector.broadcast %cst_14 : f32 to vector<2x106xf32>
    %27 = tpu.concatenate %25, %5, %26 in 1 : vector<2x2xf32>, vector<2x20xf32>, vector<2x106xf32> -> vector<2x128xf32>
    %c0_15 = arith.constant 0 : index
    %c0_16 = arith.constant 0 : index
    %28 = vector.load %arg6[%c0_15, %c0_16] : memref<2x128xf32, #tpu.memory_space<vmem>>, vector<2x128xf32>
    tpu.vector_store %arg6[%c0_15, %c0_16], %27 {strides = array<i32>} : memref<2x128xf32, #tpu.memory_space<vmem>>, vector<2x128xf32>,
    return
  }
  func.func @transform_0(%arg0: i32) -> (i32, i32) {
    %c0_i32 = arith.constant 0 : i32
    %c0_i32_0 = arith.constant 0 : i32
    return %arg0, %c0_i32 : i32, i32
  }
  func.func @transform_1(%arg0: i32) -> (i32, i32) {
    %c0_i32 = arith.constant 0 : i32
    %c0_i32_0 = arith.constant 0 : i32
    %c0_i32_1 = arith.constant 0 : i32
    return %c0_i32, %c0_i32_0 : i32, i32
  }
  func.func @transform_2(%arg0: i32) -> (i32, i32) {
    %c0_i32 = arith.constant 0 : i32
    %c0_i32_0 = arith.constant 0 : i32
    %c0_i32_1 = arith.constant 0 : i32
    return %c0_i32, %c0_i32_0 : i32, i32
  }
  func.func @transform_3(%arg0: i32) -> (i32, i32) {
    %c0_i32 = arith.constant 0 : i32
    %c0_i32_0 = arith.constant 0 : i32
    %c0_i32_1 = arith.constant 0 : i32
    return %c0_i32, %c0_i32_0 : i32, i32
  }
  func.func @transform_4(%arg0: i32) -> (i32, i32) {
    %c0_i32 = arith.constant 0 : i32
    %c0_i32_0 = arith.constant 0 : i32
    %c0_i32_1 = arith.constant 0 : i32
    return %c0_i32, %c0_i32_0 : i32, i32
  }
  func.func @transform_5(%arg0: i32) -> (i32, i32) {
    %c0_i32 = arith.constant 0 : i32
    %c0_i32_0 = arith.constant 0 : i32
    return %arg0, %c0_i32 : i32, i32
  }
}

</mosaic_0001>

<bundles_post_ra>
// kernel: tpu_custom_call.1
= control target key start
LH: loop header
LB: loop body
LE: loop exit
PB: predicated region body
PF: predicated region fallthrough
CT: control target
= control target key end

     0   :  { %v744_v27 = vmov 1983009808   ;;  %v134_v29 = vlaneseq  ;;  %s1115_s0 = inlined_call_operand.vmem [shape: f32[2,784], index: 0, kind: input, shape index: {}]   ;;  %s1116_s1 = inlined_call_operand.vmem [shape: f32[784,20], index: 1, kind: input, shape index: {}]   ;;  %s1117_s2 = inlined_call_operand.vmem [shape: f32[1,20], index: 2, kind: input, shape index: {}]   ;;  %s1118_s3 = inlined_call_operand.vmem [shape: f32[20,2], index: 3, kind: input, shape index: {}]   ;;  %s1119_s4 = inlined_call_operand.vmem [shape: f32[1,2], index: 4, kind: input, shape index: {}]   ;;  %s1120_s5 = inlined_call_operand.hbm [shape: f32[2,128], index: 5, kind: output, shape index: {}]  }
   0x1   :  { %v54_v0 = vld [vmem:[%s1116_s1 + $0xf8] sm:$0xff]  ;;  %v53_v2 = vld [vmem:[%s1116_s1 + $0xf0] sm:$0xff]  ;;  %v52_v6 = vld [vmem:[%s1116_s1 + $0xe8] sm:$0xff]  ;;  %v132_v28 = vunpack.c.l.s4 %v744_v27 }
   0x2   :  { %v38_v1 = vld [vmem:[%s1116_s1 + $0x78] sm:$0xff]  ;;  %583 = vmatprep.subr.mxu0 %v54_v0  ;;  %v37_v4 = vld [vmem:[%s1116_s1 + $0x70] sm:$0xff]  ;;  %v36_v8 = vld [vmem:[%s1116_s1 + $0x68] sm:$0xff]  ;;  %v135_v39 = vshrl.u32 %v134_v29, 7 }
   0x3   :  { %v86_v3 = vld [vmem:[%s1116_s1 + $0x1f8] sm:$0xff]  ;;  %584 = vmatpush3.msra.mxu0 %v38_v1  ;;  %v85_v7 = vld [vmem:[%s1116_s1 + $0x1f0] sm:$0xff]  ;;  %v84_v10 = vld [vmem:[%s1116_s1 + $0x1e8] sm:$0xff]  ;;  %v133_v38 = vunpack.c.0.s8 %v132_v28 }
   0x4   :  { %v70_v5 = vld [vmem:[%s1116_s1 + $0x178] sm:$0xff]  ;;  %618 = vmatprep.subr.mxu1 %v86_v3  ;;  %585 = vmatprep.subr.mxu0 %v53_v2  ;;  %v69_v9 = vld [vmem:[%s1116_s1 + $0x170] sm:$0xff]  ;;  %v51_v11 = vld [vmem:[%s1116_s1 + $0xe0] sm:$0xff] }
   0x5   :  { %619 = vmatpush3.msra.mxu1 %v70_v5  ;;  %586 = vmatpush3.msra.mxu0 %v37_v4  ;;  %v68_v12 = vld [vmem:[%s1116_s1 + $0x168] sm:$0xff]  ;;  %v35_v13 = vld [vmem:[%s1116_s1 + $0x60] sm:$0xff]  ;;  %v50_v15 = vld [vmem:[%s1116_s1 + $0xd8] sm:$0xff]  ;;  %v908_v48 = vsub.s32 %v133_v38, %v135_v39 }
   0x6   :  { %620 = vmatprep.subr.mxu1 %v85_v7  ;;  %587 = vmatprep.subr.mxu0 %v52_v6  ;;  %v83_v14 = vld [vmem:[%s1116_s1 + $0x1e0] sm:$0xff]  ;;  %v34_v17 = vld [vmem:[%s1116_s1 + $0x58] sm:$0xff]  ;;  %v49_v19 = vld [vmem:[%s1116_s1 + $0xd0] sm:$0xff] }
   0x7   :  { %621 = vmatpush3.msra.mxu1 %v69_v9  ;;  %588 = vmatpush3.msra.mxu0 %v36_v8  ;;  %v67_v16 = vld [vmem:[%s1116_s1 + $0x160] sm:$0xff]  ;;  %v82_v18 = vld [vmem:[%s1116_s1 + $0x1d8] sm:$0xff]  ;;  %v33_v21 = vld [vmem:[%s1116_s1 + $0x50] sm:$0xff] }
   0x8   :  { %622 = vmatprep.subr.mxu1 %v84_v10  ;;  %589 = vmatprep.subr.mxu0 %v51_v11  ;;  %v66_v20 = vld [vmem:[%s1116_s1 + $0x158] sm:$0xff]  ;;  %v81_v22 = vld [vmem:[%s1116_s1 + $0x1d0] sm:$0xff]  ;;  %v48_v23 = vld [vmem:[%s1116_s1 + $0xc8] sm:$0xff] }
   0x9   :  { %623 = vmatpush3.msra.mxu1 %v68_v12  ;;  %590 = vmatpush3.msra.mxu0 %v35_v13  ;;  %v65_v24 = vld [vmem:[%s1116_s1 + $0x150] sm:$0xff]  ;;  %v32_v25 = vld [vmem:[%s1116_s1 + $0x48] sm:$0xff]  ;;  %v47_v30 = vld [vmem:[%s1116_s1 + $0xc0] sm:$0xff] }
   0xa   :  { %624 = vmatprep.subr.mxu1 %v83_v14  ;;  %591 = vmatprep.subr.mxu0 %v50_v15  ;;  %v80_v26 = vld [vmem:[%s1116_s1 + $0x1c8] sm:$0xff]  ;;  %v31_v32 = vld [vmem:[%s1116_s1 + $0x40] sm:$0xff]  ;;  %v46_v34 = vld [vmem:[%s1116_s1 + $0xb8] sm:$0xff] }
   0xb   :  { %625 = vmatpush3.msra.mxu1 %v67_v16  ;;  %592 = vmatpush3.msra.mxu0 %v34_v17  ;;  %v64_v31 = vld [vmem:[%s1116_s1 + $0x148] sm:$0xff]  ;;  %v79_v33 = vld [vmem:[%s1116_s1 + $0x1c0] sm:$0xff]  ;;  %v30_v36 = vld [vmem:[%s1116_s1 + $0x38] sm:$0xff] }
   0xc   :  { %626 = vmatprep.subr.mxu1 %v82_v18  ;;  %593 = vmatprep.subr.mxu0 %v49_v19  ;;  %v63_v35 = vld [vmem:[%s1116_s1 + $0x140] sm:$0xff]  ;;  %v78_v37 = vld [vmem:[%s1116_s1 + $0x1b8] sm:$0xff]  ;;  %v45_v40 = vld [vmem:[%s1116_s1 + $0xb0] sm:$0xff] }
   0xd   :  { %627 = vmatpush3.msra.mxu1 %v66_v20  ;;  %594 = vmatpush3.msra.mxu0 %v33_v21  ;;  %v62_v41 = vld [vmem:[%s1116_s1 + $0x138] sm:$0xff]  ;;  %v29_v42 = vld [vmem:[%s1116_s1 + $0x30] sm:$0xff]  ;;  %v44_v44 = vld [vmem:[%s1116_s1 + $0xa8] sm:$0xff] }
   0xe   :  { %628 = vmatprep.subr.mxu1 %v81_v22  ;;  %595 = vmatprep.subr.mxu0 %v48_v23  ;;  %v77_v43 = vld [vmem:[%s1116_s1 + $0x1b0] sm:$0xff]  ;;  %v28_v46 = vld [vmem:[%s1116_s1 + $0x28] sm:$0xff]  ;;  %v43_v49 = vld [vmem:[%s1116_s1 + $0xa0] sm:$0xff] }
   0xf   :  { %629 = vmatpush3.msra.mxu1 %v65_v24  ;;  %596 = vmatpush3.msra.mxu0 %v32_v25  ;;  %v61_v45 = vld [vmem:[%s1116_s1 + $0x130] sm:$0xff]  ;;  %v76_v47 = vld [vmem:[%s1116_s1 + $0x1a8] sm:$0xff]  ;;  %v21_v51 = vld [vmem:[%s1115_s0] sm:$0xff] }
  0x10   :  { %630 = vmatprep.subr.mxu1 %v80_v26  ;;  %597 = vmatprep.subr.mxu0 %v47_v30  ;;  %v60_v50 = vld [vmem:[%s1116_s1 + $0x128] sm:$0xff]  ;;  %v27_v52 = vld [vmem:[%s1116_s1 + $0x20] sm:$0xff]  ;;  %v42_v54 = vld [vmem:[%s1116_s1 + $0x98] sm:$0xff]  ;;  %v137_v58 = vrot.slane %v21_v51, %v908_v48  ;;  %v130_v59 = vcombine.high %v21_v51, %v21_v51 }
  0x11   :  { %631 = vmatpush3.msra.mxu1 %v64_v31  ;;  %598 = vmatpush3.msra.mxu0 %v31_v32  ;;  %v75_v53 = vld [vmem:[%s1116_s1 + $0x1a0] sm:$0xff]  ;;  %v26_v56 = vld [vmem:[%s1116_s1 + $0x18] sm:$0xff]  ;;  %v41_v60 = vld [vmem:[%s1116_s1 + $0x90] sm:$0xff] }
  0x12   :  { %632 = vmatprep.subr.mxu1 %v79_v33  ;;  %599 = vmatprep.subr.mxu0 %v46_v34  ;;  %v59_v55 = vld [vmem:[%s1116_s1 + $0x120] sm:$0xff]  ;;  %v74_v57 = vld [vmem:[%s1116_s1 + $0x198] sm:$0xff]  ;;  %v25_v62 = vld [vmem:[%s1116_s1 + $0x10] sm:$0xff]  ;;  %v145_v4 = vcombine.high %v137_v58, %v137_v58  ;;  %v144_v5 = vrot.slane %v130_v59, %v908_v48 }
  0x13   :  { %633 = vmatpush3.msra.mxu1 %v63_v35  ;;  %600 = vmatpush3.msra.mxu0 %v30_v36  ;;  %v58_v61 = vld [vmem:[%s1116_s1 + $0x118] sm:$0xff]  ;;  %v73_v63 = vld [vmem:[%s1116_s1 + $0x190] sm:$0xff]  ;;  %v40_v0 = vld [vmem:[%s1116_s1 + $0x88] sm:$0xff] }
  0x14   :  { %634 = vmatprep.subr.mxu1 %v78_v37  ;;  %601 = vmatprep.subr.mxu0 %v45_v40  ;;  %v57_v1 = vld [vmem:[%s1116_s1 + $0x110] sm:$0xff]  ;;  %v24_v2 = vld [vmem:[%s1116_s1 + $0x8] sm:$0xff]  ;;  %v39_v6 = vld [vmem:[%s1116_s1 + $0x80] sm:$0xff]  ;;  %v146_v12 = vcombine.high %v144_v5, %v144_v5 }
  0x15   :  { %635 = vmatpush3.msra.mxu1 %v62_v41  ;;  %602 = vmatpush3.msra.mxu0 %v29_v42  ;;  %v72_v3 = vld [vmem:[%s1116_s1 + $0x188] sm:$0xff]  ;;  %v23_v7 = vld [vmem:[%s1116_s1] sm:$0xff]  ;;  %v118_v10 = vld [vmem:[%s1116_s1 + $0x2f8] sm:$0xff] }
  0x16   :  { %636 = vmatprep.subr.mxu1 %v77_v43  ;;  %603 = vmatprep.subr.mxu0 %v44_v44  ;;  %v56_v8 = vld [vmem:[%s1116_s1 + $0x108] sm:$0xff]  ;;  %v71_v9 = vld [vmem:[%s1116_s1 + $0x180] sm:$0xff]  ;;  %v102_v13 = vld [vmem:[%s1116_s1 + $0x278] sm:$0xff] }
  0x17   :  { %637 = vmatpush3.msra.mxu1 %v61_v45  ;;  %604 = vmatpush3.msra.mxu0 %v28_v46  ;;  %v55_v11 = vld [vmem:[%s1116_s1 + $0x100] sm:$0xff]  ;;  %v22_v14 = vld [vmem:[%s1115_s0 + $0x8] sm:$0x3f]  ;;  %v117_v15 = vld [vmem:[%s1116_s1 + $0x2f0] sm:$0xff] }
  0x18   :  { %638 = vmatprep.subr.mxu1 %v76_v47  ;;  %605 = vmatprep.subr.mxu0 %v43_v49  ;;  %v991_v16 = vrot.slane %v22_v14, %v908_v48 }
  0x19   :  { %639 = vmatpush3.msra.mxu1 %v60_v50  ;;  %606 = vmatpush3.msra.mxu0 %v27_v52 }
  0x1a   :  { %640 = vmatprep.subr.mxu1 %v75_v53  ;;  %607 = vmatprep.subr.mxu0 %v42_v54 }
  0x1b   :  { %641 = vmatpush3.msra.mxu1 %v59_v55  ;;  %608 = vmatpush3.msra.mxu0 %v26_v56 }
  0x1c   :  { %642 = vmatprep.subr.mxu1 %v74_v57  ;;  %609 = vmatprep.subr.mxu0 %v41_v60 }
  0x1d   :  { %643 = vmatpush3.msra.mxu1 %v58_v61  ;;  %610 = vmatpush3.msra.mxu0 %v25_v62 }
  0x1e   :  { %644 = vmatprep.subr.mxu1 %v73_v63  ;;  %611 = vmatprep.subr.mxu0 %v40_v0 }
  0x1f   :  { %645 = vmatpush3.msra.mxu1 %v57_v1  ;;  %612 = vmatpush3.msra.mxu0 %v24_v2 }
  0x20   :  { %646 = vmatprep.subr.mxu1 %v72_v3  ;;  %613 = vmatprep.subr.mxu0 %v39_v6 }
  0x21   :  { %236 = vmatprep.mubr.f32.mxu0 %v145_v4  ;;  %614 = vmatpush3.msra.mxu0 %v23_v7 }
  0x22   :  { %647 = vmatpush3.msra.mxu1 %v56_v8  ;;  %237 = vmatmul.mubr.f32.vlgmr.msra.gmra.mxu0 %v137_v58 }
  0x23   :  { %648 = vmatprep.subr.mxu1 %v71_v9 }
  0x24   :  { %10 = vsyncpa [#allocation3], 0  ;;  %653 = vmatprep.subr.mxu0 %v118_v10  ;;  %649 = vmatpush3.msra.mxu1 %v55_v11  ;;  %v101_v17 = vld [vmem:[%s1116_s1 + $0x270] sm:$0xff]  ;;  %v116_v18 = vld [vmem:[%s1116_s1 + $0x2e8] sm:$0xff]  ;;  %v147_v19 = vcombine.high %v22_v14, %v22_v14  ;;  %v162_v20 = vcombine.high %v991_v16, %v991_v16  ;;  %v745_v25 = vmov 0.0   ;;  %vm169_vm0 = vcmask 130048  }
  0x25   :  { %306 = vmatprep.mubr.f32.mxu1 %v146_v12  ;;  %654 = vmatpush3.msra.mxu0 %v102_v13  ;;  %v100_v21 = vld [vmem:[%s1116_s1 + $0x268] sm:$0xff]  ;;  %v115_v23 = vld [vmem:[%s1116_s1 + $0x2e0] sm:$0xff]  ;;  %v114_v27 = vld [vmem:[%s1116_s1 + $0x2d8] sm:$0xff]  ;;  %vm746_vm1 = vmmov 0   ;;  %vm466_vm2 = vcmask 1043456   ;;  %vm462_vm3 = vcmask 162816  }
  0x26   :  { %307 = vmatmul.mubr.f32.vlgmr.msra.gmra.mxu1 %v144_v5  ;;  %655 = vmatprep.subr.mxu0 %v117_v15  ;;  %v120_v22 = vld [vmem:[%s1116_s1 + $0x308] sm:$0xff]  ;;  %v99_v24 = vld [vmem:[%s1116_s1 + $0x260] sm:$0xff]  ;;  %v161_v28 = vrot.slane %v147_v19, %v908_v48  ;;  %v98_v29 = vld [vmem:[%s1116_s1 + $0x258] sm:$0xff]  ;;  %vm543_vm5 = vcmask 9216   ;;  %vm559_vm6 = vcmask 15360   ;;  %vm561_vm7 = vcmask 179200  }
  0x27   :  { %656 = vmatpush3.msra.mxu0 %v101_v17  ;;  %376 = vmatprep.mubr.f32.mxu0 %v162_v20  ;;  %v119_v26 = vld [vmem:[%s1116_s1 + $0x300] sm:$0xff]  ;;  %v113_v30 = vld [vmem:[%s1116_s1 + $0x2d0] sm:$0xff]  ;;  %v112_v32 = vld [vmem:[%s1116_s1 + $0x2c8] sm:$0xff] }
  0x28   :  { %657 = vmatprep.subr.mxu0 %v116_v18  ;;  %695 = vmatprep.subr.mxu1 %v745_v25  ;;  %v97_v31 = vld [vmem:[%s1116_s1 + $0x250] sm:$0xff]  ;;  %v96_v33 = vld [vmem:[%s1116_s1 + $0x248] sm:$0xff]  ;;  %v111_v34 = vld [vmem:[%s1116_s1 + $0x2c0] sm:$0xff] }
  0x29   :  { %658 = vmatpush3.msra.mxu0 %v100_v21  ;;  %696 = vmatpush3.msra.mxu1 %v120_v22  ;;  %v95_v35 = vld [vmem:[%s1116_s1 + $0x240] sm:$0xff]  ;;  %v110_v36 = vld [vmem:[%s1116_s1 + $0x2b8] sm:$0xff]  ;;  %v109_v38 = vld [vmem:[%s1116_s1 + $0x2b0] sm:$0xff] }
  0x2a   :  { %659 = vmatprep.subr.mxu0 %v115_v23  ;;  %697 = vmatprep.subr.mxu1 %v745_v25  ;;  %v94_v37 = vld [vmem:[%s1116_s1 + $0x238] sm:$0xff]  ;;  %v93_v39 = vld [vmem:[%s1116_s1 + $0x230] sm:$0xff]  ;;  %v108_v40 = vld [vmem:[%s1116_s1 + $0x2a8] sm:$0xff] }
  0x2b   :  { %660 = vmatpush3.msra.mxu0 %v99_v24  ;;  %698 = vmatpush3.msra.mxu1 %v119_v26  ;;  %v92_v41 = vld [vmem:[%s1116_s1 + $0x228] sm:$0xff]  ;;  %v107_v42 = vld [vmem:[%s1116_s1 + $0x2a0] sm:$0xff]  ;;  %v106_v44 = vld [vmem:[%s1116_s1 + $0x298] sm:$0xff] }
  0x2c   :  { %661 = vmatprep.subr.mxu0 %v114_v27  ;;  %699 = vmatprep.mubr.msk.f32.mxu1 %vm746_vm1, %v745_v25  ;;  %v91_v43 = vld [vmem:[%s1116_s1 + $0x220] sm:$0xff]  ;;  %v90_v45 = vld [vmem:[%s1116_s1 + $0x218] sm:$0xff]  ;;  %v105_v46 = vld [vmem:[%s1116_s1 + $0x290] sm:$0xff] }
  0x2d   :  { %662 = vmatpush3.msra.mxu0 %v98_v29  ;;  %700 = vmatmul.mubr.msk.f32.vlgmr.msra.gmra.mxu1 %vm169_vm0, %v161_v28  ;;  %v89_v47 = vld [vmem:[%s1116_s1 + $0x210] sm:$0xff]  ;;  %v104_v48 = vld [vmem:[%s1116_s1 + $0x288] sm:$0xff]  ;;  %v103_v50 = vld [vmem:[%s1116_s1 + $0x280] sm:$0xff] }
  0x2e   :  { %663 = vmatprep.subr.mxu0 %v113_v30  ;;  %702 = vmatprep.subr.mxu1 %v745_v25  ;;  %v88_v49 = vld [vmem:[%s1116_s1 + $0x208] sm:$0xff]  ;;  %v87_v51 = vld [vmem:[%s1116_s1 + $0x200] sm:$0xff]  ;;  %v454_v52 = vld [vmem:[%s1118_s3 + $0x10] sm:$0xf] }
  0x2f   :  { %664 = vmatpush3.msra.mxu0 %v97_v31  ;;  %708 = vmatprep.mubr.msk.f32.mxu1 %vm746_vm1, %v745_v25  ;;  %v453_v53 = vld [vmem:[%s1118_s3 + $0x8] sm:$0xff]  ;;  %v452_v54 = vld [vmem:[%s1118_s3] sm:$0xff]  ;;  %s747_s3 = smov 2  }
  0x30   :  { %665 = vmatprep.subr.mxu0 %v112_v32  ;;  %703 = vmatpush3.msk.msra.mxu1 %vm466_vm2, %v454_v52  ;;  %v578_v62 = vld [vmem:[%s1117_s2] ss:$0 sm:$0xff]  ;;  %s748_s2 = smov [#allocation2]  }
  0x31   :  { %666 = vmatpush3.msra.mxu0 %v96_v33  ;;  %704 = vmatprep.subr.mxu1 %v745_v25  ;;  %v580_v7 = vld [vmem:[%s1119_s4] ss:$0 sm:$0xff]  ;;  %s570_s4 = sshll.u32 %s748_s2, 4  ;;  %s571_s4 = int_to_ptr.vmem [resolvable:$true] %s570_s4 }
  0x32   :  { %667 = vmatprep.subr.mxu0 %v111_v34  ;;  %705 = vmatpush3.msra.mxu1 %v453_v53  ;;  %s722_s24 = scalar_lea.vmem %s571_s4, 32  ;;  %p727_p1 = scmp.lt.s32.totalorder %s571_s4, %s571_s4 }
  0x33   :  { %668 = vmatpush3.msra.mxu0 %v95_v35  ;;  %706 = vmatprep.subr.mxu1 %v745_v25  ;;  %p723_p0 = scmp.ne.s32.totalorder %s571_s4, %s722_s24  ;;  %p728_p2 = scmp.lt.s32.totalorder %s722_s24, %s722_s24 }
  0x34   :  { %669 = vmatprep.subr.mxu0 %v110_v36  ;;  %707 = vmatpush3.msra.mxu1 %v452_v54 }
  0x35   :  { %670 = vmatpush3.msra.mxu0 %v94_v37  ;;  %p729_p3 = por %p728_p2, %p727_p1 }
  0x36   :  { %671 = vmatprep.subr.mxu0 %v109_v38 }
  0x37   :  { %672 = vmatpush3.msra.mxu0 %v93_v39  ;;  %p730_p4 = pnand %p729_p3, %p723_p0 }
  0x38   :  { %673 = vmatprep.subr.mxu0 %v108_v40 }
  0x39   :  { %674 = vmatpush3.msra.mxu0 %v92_v41 }
  0x3a   :  { %675 = vmatprep.subr.mxu0 %v107_v42 }
  0x3b   :  { %676 = vmatpush3.msra.mxu0 %v91_v43 }
  0x3c   :  { %677 = vmatprep.subr.mxu0 %v106_v44 }
  0x3d   :  { %678 = vmatpush3.msra.mxu0 %v90_v45 }
  0x3e   :  { %679 = vmatprep.subr.mxu0 %v105_v46 }
  0x3f   :  { %680 = vmatpush3.msra.mxu0 %v89_v47 }
  0x40   :  { %681 = vmatprep.subr.mxu0 %v104_v48 }
  0x41   :  { %682 = vmatpush3.msra.mxu0 %v88_v49 }
  0x42   :  { %683 = vmatprep.subr.mxu0 %v103_v50 }
  0x43   :  { %684 = vmatpush3.msra.mxu0 %v87_v51 }
  0x44   :  { %377 = vmatmul.mubr.f32.vlgmr.msra.gmra.mxu0 %v991_v16 }
  0xe2   :  { %v615_v59 = vpop.f32.mrf.mxu0 }
  0xe4   :  { %v616_v60 = vpop.f32.mrf.mxu0 }
  0xe5   :  { %v617_v61 = vadd.f32 %v616_v60, %v615_v59 }
  0xe6   :  { %v650_v55 = vpop.f32.mrf.mxu1 }
  0xe7   :  { %v239_v63 = vadd.f32 %v617_v61, %v578_v62 }
  0xe8   :  { %v651_v56 = vpop.f32.mrf.mxu1 }
  0xe9   :  { %v652_v0 = vadd.f32 %v651_v56, %v650_v55 }
  0xeb   :  { %v309_v3 = vadd.f32 %v652_v0, %v239_v63 }
  0xed   :  { %v448_v57 = vpop.f32.mrf.mxu1 }
  0xef   :  { %v701_v58 = vpop.f32.mrf.mxu1 }
 0x104   :  { %v685_v1 = vpop.f32.mrf.mxu0 }
 0x106   :  { %v686_v2 = vpop.f32.mrf.mxu0 }
 0x107   :  { %v687_v4 = vadd.f32 %v686_v2, %v685_v1 }
 0x109   :  { %v379_v5 = vadd.f32 %v687_v4, %v309_v3 }
 0x10b   :  { %v449_v6 = vadd.f32 %v448_v57, %v379_v5 }
 0x10d   :  { %556 = vrot.lane.b32.xlu1 %v449_v6, %s747_s3  ;;  %709 = vmatmul.mubr.msk.f32.vlgmr.msra.gmra.mxu1 %vm462_vm3, %v449_v6 }
 0x17f   :  { %v557_v23 = vpop.permute.xlu1 %556 }
 0x1cd   :  { %v536_v8 = vpop.f32.mrf.mxu1 }
 0x1ce   :  { %v537_v9 = vadd.f32 %v580_v7, %v536_v8 }
 0x1cf   :  { %v710_v10 = vpop.f32.mrf.mxu1 }
 0x1d0   :  { %v541_v11 = vmul.f32 0.01, %v537_v9  ;;  %vm540_vm4 = vcmp.gt.f32.partialorder %v537_v9, 0.0 }
 0x1d2   :  { %v542_v12 = vsel %vm540_vm4, %v537_v9, %v541_v11 }
 0x1d3   :  { %v544_v13 = vsel %vm543_vm5, %v542_v12, -inf }
 0x1d4   :  { %545 = vmax.xlane.f32.xlu0 %v544_v13 }
 0x25d   :  { %v546_v14 = vpop.xlane.xlu0 %545 }
 0x25e   :  { %v547_v15 = vsub.f32 %v542_v12, %v546_v14 }
 0x260   :  { %v548_v16 = vmul.f32 1.442695, %v547_v15 }
 0x262   :  { %718 = vpow2.f32 %v548_v16 }
 0x26f   :  { %v719_v17 = vpop.eup %718 }
 0x270   :  { %v550_v18 = vsel %vm543_vm5, %v719_v17, 0.0 }
 0x271   :  { %551 = vadd.xlane.f32.xlu0 %v550_v18 }
 0x2fa   :  { %v552_v19 = vpop.xlane.xlu0 %551 }
 0x2fb   :  { %720 = vlog2.f32 %v552_v19 }
 0x308   :  { %v721_v20 = vpop.eup %720 }
 0x309   :  { %v554_v21 = vmul.f32 0.6931472, %v721_v20 }
 0x30b   :  { %v555_v22 = vsub.f32 %v547_v15, %v554_v21 }
 0x30d   :  { %v560_v24 = vsel %vm559_vm6, %v555_v22, %v557_v23 }
 0x30e   :  { %v562_v25 = vsel %vm561_vm7, %v560_v24, 0.0 }
 0x30f   :  { %563 = vst [vmem:[#allocation2] sm:$0x3] %v562_v25 }
 0x310   :  { %733 = shalt.err (!%p730_p4)
}
 0x311   :  { %573 = dma.vmem_to_hbm [thread:$0]  %s571_s4, 32, %s1120_s5, [#allocation3]  }
 0x312   :  { %742 = dma.done.wait [#allocation3], 32  }
 0x313   :  { %743 = vsyncadd [#allocation3], 4294967264 }
 0x314   :  { %577 = vsyncpa [#allocation3], 1 }

</bundles_post_ra>
